<compile_context>
chip_gen: v7x
topology: tpu7x:2x2x1
jax: 0.10.0
libtpu: 0.0.40
codegen_flags: <defaults>
</compile_context>

<pallas_src>
import jax
import jax.numpy as jnp
from jax.experimental import pallas as pl
from jax.experimental.pallas import tpu as pltpu


def _concat_mlp_kernel(cf_ref, se_ref, wup_c_ref, wup_s_ref, wdown_ref, out_ref):
    # cf_ref:    (bm, seq, content_dim)  f32
    # se_ref:    (bm, latency_dim)       f32
    # wup_c_ref: (content_dim, intermediate)  bf16, 1/seq pre-folded
    # wup_s_ref: (latency_dim, intermediate)  bf16
    # wdown_ref: (intermediate, hidden)       bf16
    # out_ref:   (bm, hidden)            f32
    w_dtype = wup_c_ref.dtype

    # Sum over seq in f32 (1/seq is baked into wup_c), then feed the MXU in bf16.
    cf_sum = jnp.sum(cf_ref[...], axis=1)                             # (bm, content_dim) f32

    up = jnp.dot(cf_sum.astype(w_dtype), wup_c_ref[...],
                 preferred_element_type=jnp.float32)
    up = up + jnp.dot(se_ref[...].astype(w_dtype), wup_s_ref[...],
                      preferred_element_type=jnp.float32)             # (bm, intermediate) f32
    up = jnp.maximum(up, 0.0)                                         # ReLU in f32 (VPU)

    down = jnp.dot(up.astype(w_dtype), wdown_ref[...],
                   preferred_element_type=jnp.float32)                # (bm, hidden) f32
    out_ref[...] = jnp.maximum(down, 0.0).astype(out_ref.dtype)       # ReLU; dropout = identity


def preprocess_weights(w_up, w_down, content_dim, seq_len,
                       param_dtype=jnp.bfloat16):
    """One-time weight preprocessing (do NOT call per forward).

    w_up:   (intermediate, content_dim + latency_dim)  PyTorch Linear (out, in)
    w_down: (hidden, intermediate)                     PyTorch Linear (out, in)
    Returns (w_up_c, w_up_s, w_down_t) in (in, out) layout, param_dtype,
    with the 1/seq_len mean factor folded into w_up_c.
    """
    w_up_t = jnp.transpose(w_up).astype(jnp.float32)          # (content+latency, inter)
    w_up_c = (w_up_t[:content_dim, :] / float(seq_len)).astype(param_dtype)
    w_up_s = w_up_t[content_dim:, :].astype(param_dtype)
    w_down_t = jnp.transpose(w_down).astype(param_dtype)       # (inter, hidden)
    return w_up_c, w_up_s, w_down_t


def concatenate_mlp_forward(content_features, scalar_embedding,
                            w_up_c, w_up_s, w_down_t):
    """
    content_features: (bs, seq, content_dim) f32
    scalar_embedding: (bs, latency_dim)      f32
    w_up_c/w_up_s/w_down_t: outputs of preprocess_weights (bf16, (in, out))
    returns: (bs, hidden) f32
    """
    bs, seq, content_dim = content_features.shape
    latency_dim = scalar_embedding.shape[1]
    intermediate = w_up_c.shape[1]
    hidden = w_down_t.shape[1]

    # Batch tile: full batch for small bs; cap at 256 rows (MXU-width target
    # on v6e/v7x) for large bs so weights stay resident while batch streams.
    bm = bs if bs <= 256 else 256
    grid = (pl.cdiv(bs, bm),)

    weight_bytes = (w_up_c.size + w_up_s.size + w_down_t.size) * w_up_c.dtype.itemsize
    act_bytes = (content_features.size + scalar_embedding.size) * 4 + bs * hidden * 4
    cost = pl.CostEstimate(
        flops=bs * seq * content_dim                       # seq reduction
        + 2 * bs * (content_dim + latency_dim) * intermediate
        + 2 * bs * intermediate * hidden,
        transcendentals=0,
        bytes_accessed=weight_bytes + act_bytes,
    )

    return pl.pallas_call(
        _concat_mlp_kernel,
        out_shape=jax.ShapeDtypeStruct((bs, hidden), jnp.float32),
        grid=grid,
        in_specs=[
            pl.BlockSpec((bm, seq, content_dim), lambda b: (b, 0, 0)),
            pl.BlockSpec((bm, latency_dim), lambda b: (b, 0)),
            # Weights: same block for every batch tile -> VMEM-resident.
            pl.BlockSpec((content_dim, intermediate), lambda b: (0, 0)),
            pl.BlockSpec((latency_dim, intermediate), lambda b: (0, 0)),
            pl.BlockSpec((intermediate, hidden), lambda b: (0, 0)),
        ],
        out_specs=pl.BlockSpec((bm, hidden), lambda b: (b, 0)),
        compiler_params=pltpu.CompilerParams(
            dimension_semantics=("parallel",)),
        cost_estimate=cost,
    )(content_features, scalar_embedding, w_up_c, w_up_s, w_down_t)


def reference_forward(content_features, scalar_embedding, w_up, w_down):
    # Pure f32 reference of the PyTorch module (eval mode).
    cf = jnp.mean(content_features, axis=1)
    h = jnp.concatenate([cf, scalar_embedding], axis=1)
    h = jnp.maximum(h @ w_up.T, 0.0)
    h = jnp.maximum(h @ w_down.T, 0.0)
    return h


if __name__ == "__main__":
    # config: latency_dim=16, content_dim=32; module fixes intermediate=512, hidden=64
    bs, seq = 2, 8
    latency_dim, content_dim = 16, 32
    intermediate, hidden = 512, 64

    key = jax.random.PRNGKey(0)
    k1, k2, k3, k4 = jax.random.split(key, 4)

    content_features = jax.random.normal(k1, (bs, seq, content_dim), jnp.float32)
    scalar_embedding = jax.random.normal(k2, (bs, latency_dim), jnp.float32)
    # Deterministic synthetic weights (PyTorch nn.Linear layout: (out, in)).
    w_up = 0.02 * jax.random.normal(k3, (intermediate, latency_dim + content_dim), jnp.float32)
    w_down = 0.02 * jax.random.normal(k4, (hidden, intermediate), jnp.float32)

    # One-time preprocessing (hoisted out of the per-call path).
    w_up_c, w_up_s, w_down_t = preprocess_weights(
        w_up, w_down, content_dim=content_dim, seq_len=seq)
    w_up_c, w_up_s, w_down_t = jax.block_until_ready((w_up_c, w_up_s, w_down_t))

    out = concatenate_mlp_forward(content_features, scalar_embedding,
                                  w_up_c, w_up_s, w_down_t)
    out = jax.block_until_ready(out)

    ref = reference_forward(content_features, scalar_embedding, w_up, w_down)
    assert out.shape == (bs, hidden), out.shape
    # Loose tolerance vs. the f32 reference: kernel matmul operands are bf16
    # (f32 accumulation), which is the intended deployment precision.
    assert jnp.allclose(out, ref, atol=5e-3, rtol=5e-2), "mismatch vs reference"

    print("KERNEL_OK")
</pallas_src>

<mosaic_0001>
module attributes {stable_mosaic.version = 11 : i64} {
  func.func @_concat_mlp_kernel(%arg0: i32, %arg1: memref<2x8x32xf32, #tpu.memory_space<vmem>>, %arg2: memref<2x16xf32, #tpu.memory_space<vmem>>, %arg3: memref<32x512xbf16, #tpu.memory_space<vmem>>, %arg4: memref<16x512xbf16, #tpu.memory_space<vmem>>, %arg5: memref<512x64xbf16, #tpu.memory_space<vmem>>, %arg6: memref<2x64xf32, #tpu.memory_space<vmem>>) attributes {dimension_semantics = [#tpu.dimension_semantics<parallel>], iteration_bounds = array<i64: 1>, scalar_prefetch = 0 : i64, scratch_operands = 0 : i64, tpu.core_type = #tpu.core_type<tc>, window_params = [{transform_indices = @transform_0, window_bounds = array<i64: 2, 8, 32>}, {transform_indices = @transform_1, window_bounds = array<i64: 2, 16>}, {pipeline_mode = #tpu.pipeline_mode<synchronous>, transform_indices = @transform_2, window_bounds = array<i64: 32, 512>}, {pipeline_mode = #tpu.pipeline_mode<synchronous>, transform_indices = @transform_3, window_bounds = array<i64: 16, 512>}, {pipeline_mode = #tpu.pipeline_mode<synchronous>, transform_indices = @transform_4, window_bounds = array<i64: 512, 64>}, {transform_indices = @transform_5, window_bounds = array<i64: 2, 64>}]} {
    %c0 = arith.constant 0 : index
    %c0_0 = arith.constant 0 : index
    %c0_1 = arith.constant 0 : index
    %0 = vector.load %arg1[%c0, %c0_0, %c0_1] : memref<2x8x32xf32, #tpu.memory_space<vmem>>, vector<2x8x32xf32>
    %cst = arith.constant dense<0.000000e+00> : vector<2x32xf32>
    %1 = vector.multi_reduction <add>, %0, %cst [1] : vector<2x8x32xf32> to vector<2x32xf32>
    %2 = arith.truncf %1 : vector<2x32xf32> to vector<2x32xbf16>
    %c0_2 = arith.constant 0 : index
    %c0_3 = arith.constant 0 : index
    %3 = vector.load %arg3[%c0_2, %c0_3] : memref<32x512xbf16, #tpu.memory_space<vmem>>, vector<32x512xbf16>
    %cst_4 = arith.constant dense<0.000000e+00> : vector<2x512xf32>
    %4 = tpu.matmul %2, %3, %cst_4 {dimension_numbers = #tpu.dot_dimension_numbers<[1], [0], [0], [1], [0, 0, 1, 1], [], []>} : vector<2x32xbf16>, vector<32x512xbf16>, vector<2x512xf32> -> vector<2x512xf32>
    %c0_5 = arith.constant 0 : index
    %c0_6 = arith.constant 0 : index
    %5 = vector.load %arg2[%c0_5, %c0_6] : memref<2x16xf32, #tpu.memory_space<vmem>>, vector<2x16xf32>
    %6 = arith.truncf %5 : vector<2x16xf32> to vector<2x16xbf16>
    %c0_7 = arith.constant 0 : index
    %c0_8 = arith.constant 0 : index
    %7 = vector.load %arg4[%c0_7, %c0_8] : memref<16x512xbf16, #tpu.memory_space<vmem>>, vector<16x512xbf16>
    %cst_9 = arith.constant dense<0.000000e+00> : vector<2x512xf32>
    %8 = tpu.matmul %6, %7, %cst_9 {dimension_numbers = #tpu.dot_dimension_numbers<[1], [0], [0], [1], [0, 0, 1, 1], [], []>} : vector<2x16xbf16>, vector<16x512xbf16>, vector<2x512xf32> -> vector<2x512xf32>
    %9 = arith.addf %4, %8 : vector<2x512xf32>
    %cst_10 = arith.constant 0.000000e+00 : f32
    %10 = vector.broadcast %cst_10 : f32 to vector<2x512xf32>
    %11 = arith.maximumf %9, %10 : vector<2x512xf32>
    %12 = arith.truncf %11 : vector<2x512xf32> to vector<2x512xbf16>
    %c0_11 = arith.constant 0 : index
    %c0_12 = arith.constant 0 : index
    %13 = vector.load %arg5[%c0_11, %c0_12] : memref<512x64xbf16, #tpu.memory_space<vmem>>, vector<512x64xbf16>
    %cst_13 = arith.constant dense<0.000000e+00> : vector<2x64xf32>
    %14 = tpu.matmul %12, %13, %cst_13 {dimension_numbers = #tpu.dot_dimension_numbers<[1], [0], [0], [1], [0, 0, 1, 1], [], []>} : vector<2x512xbf16>, vector<512x64xbf16>, vector<2x64xf32> -> vector<2x64xf32>
    %cst_14 = arith.constant 0.000000e+00 : f32
    %15 = vector.broadcast %cst_14 : f32 to vector<2x64xf32>
    %16 = arith.maximumf %14, %15 : vector<2x64xf32>
    %c0_15 = arith.constant 0 : index
    %c0_16 = arith.constant 0 : index
    %17 = vector.load %arg6[%c0_15, %c0_16] : memref<2x64xf32, #tpu.memory_space<vmem>>, vector<2x64xf32>
    tpu.vector_store %arg6[%c0_15, %c0_16], %16 {strides = array<i32>} : memref<2x64xf32, #tpu.memory_space<vmem>>, vector<2x64xf32>,
    return
  }
  func.func @transform_0(%arg0: i32) -> (i32, i32, i32) {
    %c0_i32 = arith.constant 0 : i32
    %c0_i32_0 = arith.constant 0 : i32
    %c0_i32_1 = arith.constant 0 : i32
    return %arg0, %c0_i32, %c0_i32_0 : i32, i32, i32
  }
  func.func @transform_1(%arg0: i32) -> (i32, i32) {
    %c0_i32 = arith.constant 0 : i32
    %c0_i32_0 = arith.constant 0 : i32
    return %arg0, %c0_i32 : i32, i32
  }
  func.func @transform_2(%arg0: i32) -> (i32, i32) {
    %c0_i32 = arith.constant 0 : i32
    %c0_i32_0 = arith.constant 0 : i32
    %c0_i32_1 = arith.constant 0 : i32
    return %c0_i32, %c0_i32_0 : i32, i32
  }
  func.func @transform_3(%arg0: i32) -> (i32, i32) {
    %c0_i32 = arith.constant 0 : i32
    %c0_i32_0 = arith.constant 0 : i32
    %c0_i32_1 = arith.constant 0 : i32
    return %c0_i32, %c0_i32_0 : i32, i32
  }
  func.func @transform_4(%arg0: i32) -> (i32, i32) {
    %c0_i32 = arith.constant 0 : i32
    %c0_i32_0 = arith.constant 0 : i32
    %c0_i32_1 = arith.constant 0 : i32
    return %c0_i32, %c0_i32_0 : i32, i32
  }
  func.func @transform_5(%arg0: i32) -> (i32, i32) {
    %c0_i32 = arith.constant 0 : i32
    %c0_i32_0 = arith.constant 0 : i32
    return %arg0, %c0_i32 : i32, i32
  }
}

</mosaic_0001>

<bundles_post_ra>
// kernel: tpu_custom_call.1
= control target key start
LH: loop header
LB: loop body
LE: loop exit
PB: predicated region body
PF: predicated region fallthrough
CT: control target
= control target key end

     0   :  { %v830_v2 = vmov 0   ;;  %vm75_vm0 = vcmask 130048   ;;  %vm24_vm1 = vcmask 261120   ;;  %vm165_vm2 = vcmask 1041409   ;;  %s1019_s0 = inlined_call_operand.vmem [shape: f32[2,8,32], index: 0, kind: input, shape index: {}]   ;;  %s1020_s1 = inlined_call_operand.vmem [shape: f32[2,16], index: 1, kind: input, shape index: {}]   ;;  %s1021_s2 = inlined_call_operand.vmem [shape: bf16[32,512], index: 2, kind: input, shape index: {}]   ;;  %s1022_s3 = inlined_call_operand.vmem [shape: bf16[16,512], index: 3, kind: input, shape index: {}]   ;;  %s1023_s4 = inlined_call_operand.vmem [shape: bf16[512,64], index: 4, kind: input, shape index: {}]   ;;  %s1024_s5 = inlined_call_operand.hbm [shape: f32[2,64], index: 5, kind: output, shape index: {}]  }
   0x1   :  { %v756_v0 = vld [vmem:[%s1022_s3 + $0x4] ss:$16 sps:$4 sm:$0xff]   ;;  %v758_v1 = vld [vmem:[%s1022_s3 + $0xc] ss:$16 sps:$4 sm:$0xff]   ;;  %111 = vmatprep.mubr.bf16.mxu0 %v830_v2  ;;  %152 = vmatprep.mubr.bf16.mxu1 %v830_v2  ;;  %v760_v3 = vld [vmem:[%s1022_s3] ss:$16 sps:$4 sm:$0xff]  }
   0x2   :  { %79 = vmatprep.subr.bf16.mxu0 %v756_v0  ;;  %v761_v4 = vld [vmem:[%s1022_s3 + $0x8] ss:$16 sps:$4 sm:$0xff]   ;;  %120 = vmatprep.subr.bf16.mxu1 %v758_v1  ;;  %v762_v5 = vld [vmem:[%s1021_s2] ss:$16 sps:$4 sm:$0xff]   ;;  %v764_v6 = vld [vmem:[%s1021_s2 + $0x4] ss:$16 sps:$4 sm:$0xff]  }
   0x3   :  { %80 = vmatpush1.bf16.msra.mxu0 %v760_v3  ;;  %121 = vmatpush1.bf16.msra.mxu1 %v761_v4  ;;  %v765_v7 = vld [vmem:[%s1021_s2 + $0x8] ss:$16 sps:$4 sm:$0xff]   ;;  %v767_v8 = vld [vmem:[%s1021_s2 + $0xc] ss:$16 sps:$4 sm:$0xff]   ;;  %v49_v9 = vld [vmem:[%s1020_s1] sm:$0x3] }
   0x4   :  { %211 = vmatprep.subr.bf16.mxu0 %v764_v6  ;;  %v50_v10 = vpack.c.bf16 %v49_v9, %v49_v9  ;;  %v770_v11 = vld [vmem:[%s1021_s2 + $0x24] ss:$16 sps:$4 sm:$0xff]   ;;  %252 = vmatprep.subr.bf16.mxu1 %v767_v8  ;;  %v768_v12 = vld [vmem:[%s1021_s2 + $0x20] ss:$16 sps:$4 sm:$0xff]   ;;  %v771_v13 = vld [vmem:[%s1021_s2 + $0x28] ss:$16 sps:$4 sm:$0xff]  }
   0x5   :  { %v773_v14 = vld [vmem:[%s1021_s2 + $0x2c] ss:$16 sps:$4 sm:$0xff]   ;;  %v22_v15 = vld [vmem:[%s1019_s0] sm:$0xff]  ;;  %v782_v45 = vld [vmem:[%s1023_s4 + $0x50] sm:$0xff]  }
   0x6   :  { %658 = vmatmul.mubr.msk.bf16.vlgmr.msra.gmra.mrb[0].mxu0 %vm75_vm0, %v50_v10  ;;  %659 = vmatmul.mubr.msk.bf16.vlgmr.msra.gmra.mrb[0].mxu1 %vm75_vm0, %v50_v10  ;;  %v23_v16 = vld [vmem:[%s1019_s0 + $0x8] sm:$0xff]  ;;  %v25_v17 = vsel %vm24_vm1, %v22_v15, 0.0  ;;  %v774_v21 = vld [vmem:[%s1023_s4 + $0x40] sm:$0xff]   ;;  %v783_v46 = vld [vmem:[%s1023_s4 + $0xd0] sm:$0xff]  }
   0x7   :  { %212 = vmatpush1.bf16.msra.mxu0 %v762_v5  ;;  %253 = vmatpush1.bf16.msra.mxu1 %v765_v7  ;;  %v32_v18 = vsel %vm24_vm1, %v23_v16, 0.0  ;;  %v26_v19 = vrot.slane %v25_v17, 4  ;;  %v775_v22 = vld [vmem:[%s1023_s4 + $0xc0] sm:$0xff]   ;;  %v778_v40 = vld [vmem:[%s1023_s4 + $0x48] sm:$0xff]   ;;  %v784_v47 = vld [vmem:[%s1023_s4 + $0x10] sm:$0xff]  }
   0x8   :  { %213 = vmatprep.subr.bf16.mxu0 %v770_v11  ;;  %254 = vmatprep.subr.bf16.mxu1 %v773_v14  ;;  %v33_v20 = vrot.slane %v32_v18, 4  ;;  %v776_v37 = vld [vmem:[%s1023_s4] sm:$0xff]   ;;  %v779_v42 = vld [vmem:[%s1023_s4 + $0xc8] sm:$0xff]   ;;  %v785_v48 = vld [vmem:[%s1023_s4 + $0x90] sm:$0xff]  }
   0x9   :  { %243 = vmatprep.mubr.bf16.mxu0 %v830_v2  ;;  %284 = vmatprep.mubr.bf16.mxu1 %v830_v2  ;;  %v27_v23 = vadd.f32 %v26_v19, %v25_v17  ;;  %v777_v38 = vld [vmem:[%s1023_s4 + $0x80] sm:$0xff]   ;;  %v780_v43 = vld [vmem:[%s1023_s4 + $0x8] sm:$0xff]   ;;  %v786_v49 = vld [vmem:[%s1023_s4 + $0x58] sm:$0xff]  }
   0xa   :  { %v34_v24 = vadd.f32 %v33_v20, %v32_v18  ;;  %v781_v44 = vld [vmem:[%s1023_s4 + $0x88] sm:$0xff]   ;;  %v787_v50 = vld [vmem:[%s1023_s4 + $0xd8] sm:$0xff]   ;;  %v790_v53 = vld [vmem:[%s1023_s4 + $0x60] sm:$0xff]  }
   0xb   :  { %214 = vmatpush1.bf16.msra.mxu0 %v768_v12  ;;  %255 = vmatpush1.bf16.msra.mxu1 %v771_v13  ;;  %v28_v25 = vrot.slane %v27_v23, 2  ;;  %v788_v51 = vld [vmem:[%s1023_s4 + $0x18] sm:$0xff]   ;;  %v791_v54 = vld [vmem:[%s1023_s4 + $0xe0] sm:$0xff]  }
   0xc   :  { %v35_v26 = vrot.slane %v34_v24, 2  ;;  %702 = vmatprep.subr.bf16.mxu0 %v774_v21  ;;  %724 = vmatprep.subr.bf16.mxu1 %v775_v22  ;;  %v789_v52 = vld [vmem:[%s1023_s4 + $0x98] sm:$0xff]  }
   0xd   :  { %v29_v27 = vadd.f32 %v28_v25, %v27_v23 }
   0xe   :  { %v36_v28 = vadd.f32 %v35_v26, %v34_v24 }
   0xf   :  { %v30_v29 = vrot.slane %v29_v27, 1 }
  0x10   :  { %v37_v30 = vrot.slane %v36_v28, 1 }
  0x11   :  { %v31_v31 = vadd.f32 %v30_v29, %v29_v27 }
  0x12   :  { %v38_v32 = vadd.f32 %v37_v30, %v36_v28 }
  0x13   :  { %v39_v33 = vpack.c.bf16 %v31_v31, %v31_v31 }
  0x14   :  { %v40_v34 = vpack.c.bf16 %v38_v32, %v38_v32 }
  0x15   :  { %v163_v35 = vunpack.c.l.b16 %v39_v33 }
  0x16   :  { %v164_v36 = vunpack.c.l.b16 %v40_v34 }
  0x18   :  { %v166_v39 = vsel %vm165_vm2, %v164_v36, %v163_v35 }
  0x19   :  { %v167_v41 = vpack.c.b16 %v166_v39, %v166_v39 }
  0x1b   :  { %668 = vmatmul.mubr.msk.bf16.vlgmr.msra.gmra.mrb[0].mxu0 %vm24_vm1, %v167_v41  ;;  %669 = vmatmul.mubr.msk.bf16.vlgmr.msra.gmra.mrb[0].mxu1 %vm24_vm1, %v167_v41 }
  0x1c   :  { %703 = vmatpush3.bf16.msra.mxu0 %v776_v37  ;;  %725 = vmatpush3.bf16.msra.mxu1 %v777_v38 }
  0x1d   :  { %704 = vmatprep.subr.bf16.mxu0 %v778_v40  ;;  %726 = vmatprep.subr.bf16.mxu1 %v779_v42 }
  0x20   :  { %705 = vmatpush3.bf16.msra.mxu0 %v780_v43  ;;  %727 = vmatpush3.bf16.msra.mxu1 %v781_v44 }
  0x21   :  { %706 = vmatprep.subr.bf16.mxu0 %v782_v45  ;;  %728 = vmatprep.subr.bf16.mxu1 %v783_v46 }
  0x24   :  { %707 = vmatpush3.bf16.msra.mxu0 %v784_v47  ;;  %729 = vmatpush3.bf16.msra.mxu1 %v785_v48 }
  0x25   :  { %708 = vmatprep.subr.bf16.mxu0 %v786_v49  ;;  %730 = vmatprep.subr.bf16.mxu1 %v787_v50 }
  0x26   :  { %10 = vsyncpa [#allocation3], 0  ;;  %v792_v55 = vld [vmem:[%s1023_s4 + $0x20] sm:$0xff]   ;;  %v794_v57 = vld [vmem:[%s1023_s4 + $0x68] sm:$0xff]   ;;  %vm638_vm3 = vcmask 517120  }
  0x27   :  { %v793_v56 = vld [vmem:[%s1023_s4 + $0xa0] sm:$0xff]   ;;  %v795_v58 = vld [vmem:[%s1023_s4 + $0xe8] sm:$0xff]   ;;  %v798_v61 = vld [vmem:[%s1023_s4 + $0x70] sm:$0xff]  }
  0x28   :  { %709 = vmatpush3.bf16.msra.mxu0 %v788_v51  ;;  %731 = vmatpush3.bf16.msra.mxu1 %v789_v52  ;;  %v796_v59 = vld [vmem:[%s1023_s4 + $0x28] sm:$0xff]   ;;  %v799_v62 = vld [vmem:[%s1023_s4 + $0xf0] sm:$0xff]   ;;  %v802_v1 = vld [vmem:[%s1023_s4 + $0x78] sm:$0xff]  }
  0x29   :  { %710 = vmatprep.subr.bf16.mxu0 %v790_v53  ;;  %732 = vmatprep.subr.bf16.mxu1 %v791_v54  ;;  %v797_v60 = vld [vmem:[%s1023_s4 + $0xa8] sm:$0xff]   ;;  %v800_v63 = vld [vmem:[%s1023_s4 + $0x30] sm:$0xff]   ;;  %v803_v2 = vld [vmem:[%s1023_s4 + $0xf8] sm:$0xff]  }
  0x2a   :  { %v801_v0 = vld [vmem:[%s1023_s4 + $0xb0] sm:$0xff]   ;;  %v804_v3 = vld [vmem:[%s1023_s4 + $0x38] sm:$0xff]  }
  0x2b   :  { %v805_v4 = vld [vmem:[%s1023_s4 + $0xb8] sm:$0xff]   ;;  %s831_s4 = smov [#allocation2]  }
  0x2c   :  { %711 = vmatpush3.bf16.msra.mxu0 %v792_v55  ;;  %733 = vmatpush3.bf16.msra.mxu1 %v793_v56  ;;  %s646_s25 = sshll.u32 %s831_s4, 4  ;;  %s647_s25 = int_to_ptr.vmem [resolvable:$true] %s646_s25 }
  0x2d   :  { %712 = vmatprep.subr.bf16.mxu0 %v794_v57  ;;  %734 = vmatprep.subr.bf16.mxu1 %v795_v58  ;;  %s806_s26 = scalar_lea.vmem %s647_s25, 32  ;;  %p811_p1 = scmp.lt.s32.totalorder %s647_s25, %s647_s25 }
  0x2e   :  { %p807_p0 = scmp.ne.s32.totalorder %s647_s25, %s806_s26  ;;  %p812_p2 = scmp.lt.s32.totalorder %s806_s26, %s806_s26 }
  0x30   :  { %713 = vmatpush3.bf16.msra.mxu0 %v796_v59  ;;  %735 = vmatpush3.bf16.msra.mxu1 %v797_v60  ;;  %p813_p3 = por %p812_p2, %p811_p1 }
  0x31   :  { %714 = vmatprep.subr.bf16.mxu0 %v798_v61  ;;  %736 = vmatprep.subr.bf16.mxu1 %v799_v62 }
  0x32   :  { %p814_p4 = pnand %p813_p3, %p807_p0 }
  0x34   :  { %715 = vmatpush3.bf16.msra.mxu0 %v800_v63  ;;  %737 = vmatpush3.bf16.msra.mxu1 %v801_v0 }
  0x35   :  { %716 = vmatprep.subr.bf16.mxu0 %v802_v1  ;;  %738 = vmatprep.subr.bf16.mxu1 %v803_v2 }
  0x38   :  { %717 = vmatpush3.bf16.msra.mxu0 %v804_v3  ;;  %739 = vmatpush3.bf16.msra.mxu1 %v805_v4 }
  0xee   :  { %v245_v5 = vpop.f32.mrb[0].mxu0  ;;  %v286_v6 = vpop.f32.mrb[0].mxu1 }
  0xef   :  { %v293_v7 = vmax.f32 %v245_v5, 0.0  ;;  %v295_v8 = vmax.f32 %v286_v6, 0.0  ;;  %v247_v9 = vpop.f32.mrb[1].mxu0  ;;  %v288_v10 = vpop.f32.mrb[1].mxu1 }
  0xf0   :  { %v294_v11 = vmax.f32 %v247_v9, 0.0  ;;  %v296_v12 = vmax.f32 %v288_v10, 0.0  ;;  %v249_v13 = vpop.f32.mrb[2].mxu0  ;;  %v290_v14 = vpop.f32.mrb[2].mxu1 }
  0xf1   :  { %v250_v15 = vpop.f32.mrb[3].mxu0  ;;  %v291_v16 = vpop.f32.mrb[3].mxu1  ;;  %v297_v19 = vpack.c.bf16 %v293_v7, %v293_v7  ;;  %v299_v20 = vpack.c.bf16 %v295_v8, %v295_v8 }
  0xf2   :  { %v298_v17 = vpack.c.bf16 %v294_v11, %v294_v11  ;;  %v300_v18 = vpack.c.bf16 %v296_v12, %v296_v12 }
  0xf4   :  { %589 = vmatprep.mubr.bf16.mxu0 %v298_v17  ;;  %629 = vmatprep.mubr.bf16.mxu1 %v300_v18 }
  0xf5   :  { %590 = vmatmul.mubr.bf16.vlgmr.msra.gmra.mrb[4].mxu0 %v297_v19  ;;  %630 = vmatmul.mubr.bf16.vlgmr.msra.gmra.mrb[4].mxu1 %v299_v20 }
 0x1c8   :  { %v718_v21 = vpop.f32.mrb[4].mxu0  ;;  %v740_v22 = vpop.f32.mrb[4].mxu1 }
 0x1c9   :  { %v719_v23 = vpop.f32.mrb[5].mxu0  ;;  %v741_v24 = vpop.f32.mrb[5].mxu1 }
 0x1ca   :  { %v720_v25 = vadd.f32 %v719_v23, %v718_v21  ;;  %v742_v26 = vadd.f32 %v741_v24, %v740_v22  ;;  %v721_v27 = vpop.f32.mrb[6].mxu0  ;;  %v743_v28 = vpop.f32.mrb[6].mxu1 }
 0x1cb   :  { %v722_v29 = vpop.f32.mrb[7].mxu0  ;;  %v744_v30 = vpop.f32.mrb[7].mxu1 }
 0x1cc   :  { %v632_v31 = vadd.f32 %v742_v26, %v720_v25 }
 0x1ce   :  { %v637_v32 = vmax.f32 %v632_v31, 0.0 }
 0x1d0   :  { %639 = vst.msk [vmem:[#allocation2] sm:$0x3] %vm638_vm3, %v637_v32 }
 0x1d1   :  { %817 = shalt.err (!%p814_p4)
}
 0x1d2   :  { %s818_s29 = scalar_lea.hbm %s1024_s5, 32 }
 0x1d3   :  { %p819_p5 = scmp.ne.s32.totalorder %s1024_s5, %s818_s29  ;;  %p822_p6 = scmp.lt.u32.totalorder %s818_s29, %s1024_s5 }
 0x1d5   :  { %p824_p7 = pnand %p822_p6, %p819_p5 }
 0x1d7   :  { %827 = shalt.err (!%p824_p7)
}
 0x1d8   :  { %649 = dma.vmem_to_hbm [thread:$0]  %s647_s25, 32, %s1024_s5, [#allocation3]  }
 0x1d9   :  { %828 = dma.done.wait [#allocation3], 32  }
 0x1da   :  { %829 = vsyncadd [#allocation3], 4294967264 }
 0x1db   :  { %653 = vsyncpa [#allocation3], 1 }

</bundles_post_ra>
